<compile_context>
chip_gen: v7x
topology: tpu7x:2x2x1
jax: 0.10.0
libtpu: 0.0.40
codegen_flags: <defaults>
</compile_context>

<pallas_src>
import functools

import jax
import jax.numpy as jnp
from jax.experimental import pallas as pl
from jax.experimental.pallas import tpu as pltpu

N_STATES = 16
N_ACTIONS = 4
HIDDEN = (50, 25, 10)

LANE = 128      # lane width of the packed parameter buffer
SUBLANE = 8     # f32 sublane granularity (row alignment of packed segments)
TILE_M = 128    # batch rows per grid step


def _round_up(x, m):
    return (x + m - 1) // m * m


def pack_params(params):
    """Pack all (W, b) pairs into one (rows, LANE) f32 buffer.

    Every segment starts at a row that is a multiple of SUBLANE; columns are
    zero-padded out to LANE.  Returns (packed, meta) where
    meta[i] = (w_row, b_row, fan_in, fan_out) are static Python ints used for
    static slicing inside the kernel.
    """
    segs = []
    meta = []
    row = 0
    for w, b in params:
        fan_in, fan_out = w.shape
        w_row = row
        segs.append(jnp.zeros((fan_in, LANE), jnp.float32).at[:, :fan_out].set(w))
        row += fan_in
        pad = _round_up(row, SUBLANE) - row
        if pad:
            segs.append(jnp.zeros((pad, LANE), jnp.float32))
            row += pad
        b_row = row
        segs.append(jnp.zeros((1, LANE), jnp.float32)
                    .at[:, :fan_out].set(b.reshape(1, fan_out)))
        row += 1
        pad = _round_up(row, SUBLANE) - row
        if pad:
            segs.append(jnp.zeros((pad, LANE), jnp.float32))
            row += pad
        meta.append((w_row, b_row, fan_in, fan_out))
    packed = jnp.concatenate(segs, axis=0)
    return packed, tuple(meta)


def mlp_kernel(x_ref, p_ref, o_ref, *, meta):
    """One batch tile: x (TILE_M, N_STATES) -> o (TILE_M, N_ACTIONS)."""
    h = x_ref[...]
    n_layers = len(meta)
    for i, (w_row, b_row, fan_in, fan_out) in enumerate(meta):
        w = p_ref[w_row:w_row + fan_in, 0:fan_out]   # static slices of the
        b = p_ref[b_row:b_row + 1, 0:fan_out]        # packed param buffer
        h = jnp.dot(h, w, preferred_element_type=jnp.float32) + b
        if i < n_layers - 1:
            h = jnp.maximum(h, 0.0)
    o_ref[...] = h.astype(o_ref.dtype)


def net_forward(x, packed, meta, *, tile_m=TILE_M):
    """y = Net(x) with x: (batch, N_STATES) f32, returns (batch, N_ACTIONS)."""
    batch = x.shape[0]
    padded = _round_up(max(batch, tile_m), tile_m)
    if padded != batch:
        x = jnp.pad(x, ((0, padded - batch), (0, 0)))
    n_tiles = padded // tile_m

    kernel = functools.partial(mlp_kernel, meta=meta)
    out_shape = jax.ShapeDtypeStruct((padded, N_ACTIONS), jnp.float32)
    out = pl.pallas_call(
        kernel,
        out_shape=out_shape,
        grid_spec=pltpu.PrefetchScalarGridSpec(
            num_scalar_prefetch=0,
            grid=(n_tiles,),
            in_specs=[
                # batch tile of activations, pipelined over the grid
                pl.BlockSpec((tile_m, N_STATES), lambda i: (i, 0)),
                # packed parameters: constant block index -> VMEM-resident
                pl.BlockSpec(packed.shape, lambda i: (0, 0)),
            ],
            out_specs=pl.BlockSpec((tile_m, N_ACTIONS), lambda i: (i, 0)),
        ),
        compiler_params=pltpu.CompilerParams(
            dimension_semantics=("parallel",)),
    )(x, packed)
    return out[:batch]


def init_params(key):
    """Mirror the PyTorch module: weight ~ N(0, 0.1), bias ~ U(-1/sqrt(fan_in), 1/sqrt(fan_in))."""
    dims = [N_STATES, *HIDDEN, N_ACTIONS]
    params = []
    for fan_in, fan_out in zip(dims[:-1], dims[1:]):
        key, kw, kb = jax.random.split(key, 3)
        w = 0.1 * jax.random.normal(kw, (fan_in, fan_out), dtype=jnp.float32)
        bound = 1.0 / jnp.sqrt(float(fan_in))
        b = jax.random.uniform(kb, (fan_out,), dtype=jnp.float32,
                               minval=-bound, maxval=bound)
        params.append((w, b))
    return params


def reference_forward(x, params):
    h = x
    for i, (w, b) in enumerate(params):
        h = h @ w + b
        if i < len(params) - 1:
            h = jnp.maximum(h, 0.0)
    return h


if __name__ == "__main__":
    key = jax.random.PRNGKey(0)
    key, kx = jax.random.split(key)

    # A DQN-replay-sized batch (2 grid steps of 128 rows) so launch/DMA
    # overhead is amortized and both v7x TensorCores get a tile.
    batch = 256
    x = jax.random.normal(kx, (batch, N_STATES), dtype=jnp.float32)

    params = init_params(key)
    packed, meta = pack_params(params)

    out = net_forward(x, packed, meta)
    out = jax.block_until_ready(out)

    ref = reference_forward(x, params)
    assert out.shape == (batch, N_ACTIONS)
    assert jnp.allclose(out, ref, atol=1e-5, rtol=1e-5)

    # Also exercise a batch that is not a multiple of the tile (padding path).
    out_small = jax.block_until_ready(net_forward(x[:37], packed, meta))
    assert jnp.allclose(out_small, ref[:37], atol=1e-5, rtol=1e-5)

    print("KERNEL_OK")
</pallas_src>

<mosaic_0001>
module attributes {stable_mosaic.version = 11 : i64} {
  func.func @mlp_kernel(%arg0: i32, %arg1: memref<128x16xf32, #tpu.memory_space<vmem>>, %arg2: memref<152x128xf32, #tpu.memory_space<vmem>>, %arg3: memref<128x4xf32, #tpu.memory_space<vmem>>) attributes {dimension_semantics = [#tpu.dimension_semantics<parallel>], iteration_bounds = array<i64: 2>, scalar_prefetch = 0 : i64, scratch_operands = 0 : i64, tpu.core_type = #tpu.core_type<tc>, window_params = [{transform_indices = @transform_0, window_bounds = array<i64: 128, 16>}, {pipeline_mode = #tpu.pipeline_mode<synchronous>, transform_indices = @transform_1, window_bounds = array<i64: 152, 128>}, {transform_indices = @transform_2, window_bounds = array<i64: 128, 4>}]} {
    %c0 = arith.constant 0 : index
    %c0_0 = arith.constant 0 : index
    %0 = vector.load %arg1[%c0, %c0_0] : memref<128x16xf32, #tpu.memory_space<vmem>>, vector<128x16xf32>
    %c0_1 = arith.constant 0 : index
    %c0_2 = arith.constant 0 : index
    %1 = vector.load %arg2[%c0_1, %c0_2] : memref<152x128xf32, #tpu.memory_space<vmem>>, vector<16x50xf32>
    %c16 = arith.constant 16 : index
    %c0_3 = arith.constant 0 : index
    %2 = vector.load %arg2[%c16, %c0_3] : memref<152x128xf32, #tpu.memory_space<vmem>>, vector<1x50xf32>
    %cst = arith.constant dense<0.000000e+00> : vector<128x50xf32>
    %3 = tpu.matmul %0, %1, %cst {dimension_numbers = #tpu.dot_dimension_numbers<[1], [0], [0], [1], [0, 0, 1, 1], [], []>} : vector<128x16xf32>, vector<16x50xf32>, vector<128x50xf32> -> vector<128x50xf32>
    %4 = vector.broadcast %2 : vector<1x50xf32> to vector<128x50xf32>
    %5 = arith.addf %3, %4 : vector<128x50xf32>
    %cst_4 = arith.constant 0.000000e+00 : f32
    %6 = vector.broadcast %cst_4 : f32 to vector<128x50xf32>
    %7 = arith.maximumf %5, %6 : vector<128x50xf32>
    %c24 = arith.constant 24 : index
    %c0_5 = arith.constant 0 : index
    %8 = vector.load %arg2[%c24, %c0_5] : memref<152x128xf32, #tpu.memory_space<vmem>>, vector<50x25xf32>
    %c80 = arith.constant 80 : index
    %c0_6 = arith.constant 0 : index
    %9 = vector.load %arg2[%c80, %c0_6] : memref<152x128xf32, #tpu.memory_space<vmem>>, vector<1x25xf32>
    %cst_7 = arith.constant dense<0.000000e+00> : vector<128x25xf32>
    %10 = tpu.matmul %7, %8, %cst_7 {dimension_numbers = #tpu.dot_dimension_numbers<[1], [0], [0], [1], [0, 0, 1, 1], [], []>} : vector<128x50xf32>, vector<50x25xf32>, vector<128x25xf32> -> vector<128x25xf32>
    %11 = vector.broadcast %9 : vector<1x25xf32> to vector<128x25xf32>
    %12 = arith.addf %10, %11 : vector<128x25xf32>
    %cst_8 = arith.constant 0.000000e+00 : f32
    %13 = vector.broadcast %cst_8 : f32 to vector<128x25xf32>
    %14 = arith.maximumf %12, %13 : vector<128x25xf32>
    %c88 = arith.constant 88 : index
    %c0_9 = arith.constant 0 : index
    %15 = vector.load %arg2[%c88, %c0_9] : memref<152x128xf32, #tpu.memory_space<vmem>>, vector<25x10xf32>
    %c120 = arith.constant 120 : index
    %c0_10 = arith.constant 0 : index
    %16 = vector.load %arg2[%c120, %c0_10] : memref<152x128xf32, #tpu.memory_space<vmem>>, vector<1x10xf32>
    %cst_11 = arith.constant dense<0.000000e+00> : vector<128x10xf32>
    %17 = tpu.matmul %14, %15, %cst_11 {dimension_numbers = #tpu.dot_dimension_numbers<[1], [0], [0], [1], [0, 0, 1, 1], [], []>} : vector<128x25xf32>, vector<25x10xf32>, vector<128x10xf32> -> vector<128x10xf32>
    %18 = vector.broadcast %16 : vector<1x10xf32> to vector<128x10xf32>
    %19 = arith.addf %17, %18 : vector<128x10xf32>
    %cst_12 = arith.constant 0.000000e+00 : f32
    %20 = vector.broadcast %cst_12 : f32 to vector<128x10xf32>
    %21 = arith.maximumf %19, %20 : vector<128x10xf32>
    %c128 = arith.constant 128 : index
    %c0_13 = arith.constant 0 : index
    %22 = vector.load %arg2[%c128, %c0_13] : memref<152x128xf32, #tpu.memory_space<vmem>>, vector<10x4xf32>
    %c144 = arith.constant 144 : index
    %c0_14 = arith.constant 0 : index
    %23 = vector.load %arg2[%c144, %c0_14] : memref<152x128xf32, #tpu.memory_space<vmem>>, vector<1x4xf32>
    %cst_15 = arith.constant dense<0.000000e+00> : vector<128x4xf32>
    %24 = tpu.matmul %21, %22, %cst_15 {dimension_numbers = #tpu.dot_dimension_numbers<[1], [0], [0], [1], [0, 0, 1, 1], [], []>} : vector<128x10xf32>, vector<10x4xf32>, vector<128x4xf32> -> vector<128x4xf32>
    %25 = vector.broadcast %23 : vector<1x4xf32> to vector<128x4xf32>
    %26 = arith.addf %24, %25 : vector<128x4xf32>
    %c0_16 = arith.constant 0 : index
    %c0_17 = arith.constant 0 : index
    %27 = vector.load %arg3[%c0_16, %c0_17] : memref<128x4xf32, #tpu.memory_space<vmem>>, vector<128x4xf32>
    tpu.vector_store %arg3[%c0_16, %c0_17], %26 {strides = array<i32>} : memref<128x4xf32, #tpu.memory_space<vmem>>, vector<128x4xf32>,
    return
  }
  func.func @transform_0(%arg0: i32) -> (i32, i32) {
    %c0_i32 = arith.constant 0 : i32
    %c0_i32_0 = arith.constant 0 : i32
    return %arg0, %c0_i32 : i32, i32
  }
  func.func @transform_1(%arg0: i32) -> (i32, i32) {
    %c0_i32 = arith.constant 0 : i32
    %c0_i32_0 = arith.constant 0 : i32
    %c0_i32_1 = arith.constant 0 : i32
    return %c0_i32, %c0_i32_0 : i32, i32
  }
  func.func @transform_2(%arg0: i32) -> (i32, i32) {
    %c0_i32 = arith.constant 0 : i32
    %c0_i32_0 = arith.constant 0 : i32
    return %arg0, %c0_i32 : i32, i32
  }
}

</mosaic_0001>

<bundles_post_ra>
// kernel: tpu_custom_call.1
= control target key start
LH: loop header
LB: loop body
LE: loop exit
PB: predicated region body
PF: predicated region fallthrough
CT: control target
= control target key end

     0   :  { %s1460_s9 = smov 0   ;;  %s1674_s0 = inlined_call_operand.vmem [shape: f32[256,16], index: 0, kind: input, shape index: {}]   ;;  %s1675_s1 = inlined_call_operand.vmem [shape: f32[152,128], index: 1, kind: input, shape index: {}]   ;;  %s1676_s2 = inlined_call_operand.vmem [shape: f32[256,4], index: 2, kind: output, shape index: {}]  }
   0x1 LB: > { %s1106_s10 = sadd.s32 4294967295, %s1442_s9   ;;  %p1110_p0 = scmp.ge.s32.totalorder %s1442_s9, 1  ;;  %s1442_s9 = sphi %s1460_s9, %s12_s9  }
   0x2   : > { %p113_p1 = scmp.lt.s32.totalorder %s1442_s9, 3 }
   0x4   : > { %p114_p2 = pnand %p1110_p0, %p113_p1 }
   0x5   : > { %v163_v0 = vld [vmem:[%s1675_s1] sm:$0xff] (!%p114_p2)  ;;  %v164_v1 = vld [vmem:[%s1675_s1 + $0x8] sm:$0xff] (!%p114_p2)  ;;  %s1111_s15 = sshll.u32 (!%p114_p2), %s1106_s10, 4  ;;  %v380_v2 = vld [vmem:[%s1675_s1 + $0x18] sm:$0xff] (!%p114_p2)  ;;  %vm170_vm0 = vcmask (!%p114_p2), 130048   ;;  %vm441_vm1 = vcmask (!%p114_p2), 1041408  }
   0x6   : > { %117 = sbr.rel (%p114_p2) target bundleno = 916 (0x394), region = 28  ;;  %v1393_v3 = vpack.c.bf16 (!%p114_p2), %v164_v1, %v163_v0  ;;  %p136_p3 = scmp.lt.s32.totalorder (!%p114_p2), %s1111_s15, 31  ;;  %v381_v4 = vld [vmem:[%s1675_s1 + $0x20] sm:$0xff] (!%p114_p2)  ;;  %v382_v5 = vld [vmem:[%s1675_s1 + $0x28] sm:$0xff] (!%p114_p2)  ;;  %v383_v6 = vld [vmem:[%s1675_s1 + $0x30] sm:$0xff] (!%p114_p2)  ;;  %vm664_vm2 = vcmask (!%p114_p2), 1040384  }
   0x7   : > { %v1397_v7 = vpack.c.bf16 (!%p114_p2), %v381_v4, %v380_v2  ;;  %v1401_v8 = vpack.c.bf16 (!%p114_p2), %v383_v6, %v382_v5  ;;  %v384_v25 = vld [vmem:[%s1675_s1 + $0x38] sm:$0xff] (!%p114_p2)  ;;  %v385_v26 = vld [vmem:[%s1675_s1 + $0x40] sm:$0xff] (!%p114_p2)  ;;  %v386_v28 = vld [vmem:[%s1675_s1 + $0x48] sm:$0x3] (!%p114_p2)  ;;  %vm1444_vm3 = vmmov (!%p114_p2), 1   ;;  %vm392_vm5 = vcmask (!%p114_p2), 408576  }
   0x8   : > { %1394 = vmatprep.subr.bf16.mxu0 (!%p114_p2), %v1393_v3  ;;  %v1405_v27 = vpack.c.bf16 (!%p114_p2), %v385_v26, %v384_v25  ;;  %v606_v29 = vld [vmem:[%s1675_s1 + $0x58] sm:$0xff] (!%p114_p2)  ;;  %v607_v30 = vld [vmem:[%s1675_s1 + $0x60] sm:$0xff] (!%p114_p2)  ;;  %v608_v31 = vld [vmem:[%s1675_s1 + $0x68] sm:$0xff] (!%p114_p2)  ;;  %vm615_vm7 = vcmask (!%p114_p2), 203776   ;;  %vm836_vm8 = vcmask (!%p114_p2), 80896   ;;  %vm1033_vm9 = vcmask (!%p114_p2), 31744  }
   0x9   : > { %1396 = vmatpush3.bf16.msra.mxu0 (!%p114_p2), %v1393_v3  ;;  %1398 = vmatprep.subr.bf16.mxu1 (!%p114_p2), %v1397_v7  ;;  %v1409_v32 = vpack.c.bf16 (!%p114_p2), %v607_v30, %v606_v29  ;;  %v609_v33 = vld [vmem:[%s1675_s1 + $0x70] sm:$0x1] (!%p114_p2)  ;;  %vm1414_vm4 = vmpackc.low (!%p114_p2), %vm664_vm2, %vm1444_vm3 }
   0xa   : > { %1400 = vmatpush3.bf16.msra.mxu1 (!%p114_p2), %v1397_v7  ;;  %v1413_v34 = vpack.c.bf16 (!%p114_p2), %v609_v33, %v608_v31  ;;  %v1115_v35 = vld [vmem:[%s1675_s1 + $0x10] ss:$0 sm:$0xff] (!%p114_p2)  ;;  %vm1579_vm6 = vmpackc.low (!%p114_p2), %vm441_vm1, %vm1444_vm3 }
   0xb   : > { %1402 = vmatprep.subr.bf16.mxu1 (!%p114_p2), %v1401_v8  ;;  %1410 = vmatprep.subr.bf16.mxu0 (!%p114_p2), %v1409_v32 }
   0xd   : > { %s1680_s15 = smov (!%p136_p3, %s1111_s15), 31 }
   0xe   : > { %s1112_s24 = sshll.u32 %s1680_s15, 3  ;;  %1404 = vmatpush3.bf16.msra.mxu1 %v1401_v8 }
   0xf   : > { %s1494_s27 = scalar_lea.vmem %s1674_s0, %s1112_s24  ;;  %1406 = vmatprep.subr.bf16.mxu1 %v1405_v27  ;;  %s1637_s3 = scalar_lea.vmem %s1676_s2, %s1112_s24 }
  0x10   : > { %v147_v9 = vld [vmem:[%s1494_s27] sm:$0xff]  ;;  %v148_v10 = vld [vmem:[%s1494_s27 + $0x8] sm:$0xff]  ;;  %v149_v11 = vld [vmem:[%s1494_s27 + $0x10] sm:$0xff] }
  0x11   : > { %1271 = vmatprep.mubr.msk.f32.mxu0 %vm170_vm0, %v147_v9  ;;  %v150_v12 = vld [vmem:[%s1494_s27 + $0x18] sm:$0xff]  ;;  %v151_v13 = vld [vmem:[%s1494_s27 + $0x20] sm:$0xff]  ;;  %v152_v14 = vld [vmem:[%s1494_s27 + $0x28] sm:$0xff] }
  0x12   : > { %1272 = vmatmul.mubr.msk.f32.vlgmr.msra.gmra.mrb[0].mxu0 %vm170_vm0, %v148_v10  ;;  %v153_v15 = vld [vmem:[%s1494_s27 + $0x30] sm:$0xff]  ;;  %v154_v16 = vld [vmem:[%s1494_s27 + $0x38] sm:$0xff]  ;;  %v155_v17 = vld [vmem:[%s1494_s27 + $0x40] sm:$0xff]  ;;  %1408 = vmatpush3.bf16.msra.mxu1 %v1405_v27 }
  0x13   : > { %1274 = vmatprep.mubr.msk.f32.mxu0 %vm170_vm0, %v149_v11  ;;  %v156_v18 = vld [vmem:[%s1494_s27 + $0x48] sm:$0xff]  ;;  %v157_v19 = vld [vmem:[%s1494_s27 + $0x50] sm:$0xff]  ;;  %v158_v20 = vld [vmem:[%s1494_s27 + $0x58] sm:$0xff]  ;;  %1307 = vmatprep.subr.msk.mxu1 %vm441_vm1, %v386_v28 }
  0x14   : > { %v159_v21 = vld [vmem:[%s1494_s27 + $0x60] sm:$0xff]  ;;  %v160_v22 = vld [vmem:[%s1494_s27 + $0x68] sm:$0xff]  ;;  %v161_v23 = vld [vmem:[%s1494_s27 + $0x70] sm:$0xff]  ;;  %1412 = vmatpush3.bf16.msra.mxu0 %v1409_v32 }
  0x15   : > { %v162_v24 = vld [vmem:[%s1494_s27 + $0x78] sm:$0xff]  ;;  %1415 = vmatprep.subr.msk.bf16.mxu0 %vm1414_vm4, %v1413_v34 }
  0x16   : > { %1275 = vmatmul.mubr.msk.f32.gmra.mrb[2].mxu0 %vm170_vm0, %v150_v12  ;;  %1308 = vmatpush3.msk.msra.mxu1 %vm441_vm1, %v386_v28 }
  0x17   : > { %1277 = vmatprep.mubr.msk.f32.mxu0 %vm170_vm0, %v151_v13 }
  0x18   : > { %1418 = vmatpush3.bf16.msk.msra.mxu0 %vm1414_vm4, %v1413_v34 }
  0x1a   : > { %1278 = vmatmul.mubr.msk.f32.gmra.mrb[4].mxu0 %vm170_vm0, %v152_v14 }
  0x1b   : > { %1280 = vmatprep.mubr.msk.f32.mxu0 %vm170_vm0, %v153_v15 }
  0x1e   : > { %1281 = vmatmul.mubr.msk.f32.gmra.mrb[6].mxu0 %vm170_vm0, %v154_v16 }
  0x1f   : > { %1283 = vmatprep.mubr.msk.f32.mxu0 %vm170_vm0, %v155_v17 }
  0x22   : > { %1284 = vmatmul.mubr.msk.f32.gmra.mrb[8].mxu0 %vm170_vm0, %v156_v18 }
  0x23   : > { %1286 = vmatprep.mubr.msk.f32.mxu0 %vm170_vm0, %v157_v19 }
  0x26   : > { %1287 = vmatmul.mubr.msk.f32.gmra.mrb[10].mxu0 %vm170_vm0, %v158_v20  ;;  %v829_v20 = vld [vmem:[%s1675_s1 + $0x80] sm:$0xff] }
  0x27   : > { %1289 = vmatprep.mubr.msk.f32.mxu0 %vm170_vm0, %v159_v21  ;;  %v830_v21 = vld [vmem:[%s1675_s1 + $0x88] sm:$0x3] }
  0x2a   : > { %1290 = vmatmul.mubr.msk.f32.gmra.mrb[12].mxu0 %vm170_vm0, %v160_v22 }
  0x2b   : > { %1292 = vmatprep.mubr.msk.f32.mxu0 %vm170_vm0, %v161_v23  ;;  %v1419_v23 = vpack.c.bf16 %v830_v21, %v829_v20 }
  0x2d   : > { %1425 = vmatprep.subr.msk.bf16.mxu1 %vm1579_vm6, %v1419_v23  ;;  %1421 = vmatprep.subr.msk.bf16.mxu0 %vm1579_vm6, %v1419_v23 }
  0x2e   : > { %1293 = vmatmul.mubr.msk.f32.gmra.mrb[14].mxu0 %vm170_vm0, %v162_v24  ;;  %v1132_v24 = vld [vmem:[%s1675_s1 + $0x50] ss:$0 sm:$0xff] }
  0xe5   : > { %v1273_v36 = vpop.f32.mrb[0].mxu0 }
  0xe6   : > { %v291_v37 = vadd.f32 %v1273_v36, %v1115_v35  ;;  %v285_v38 = vpop.f32.mrb[1].mxu0 }
  0xe7   : > { %v286_v39 = vadd.f32 %v1115_v35, %v285_v38 }
  0xe8   : > { %v365_v42 = vmax.f32 %v291_v37, 0.0 }
  0xe9   : > { %v364_v40 = vmax.f32 %v286_v39, 0.0  ;;  %v1276_v41 = vpop.f32.mrb[2].mxu0 }
  0xea   : > { %v301_v43 = vadd.f32 %v1276_v41, %v1115_v35  ;;  %v295_v44 = vpop.f32.mrb[3].mxu0 }
  0xeb   : > { %v296_v45 = vadd.f32 %v1115_v35, %v295_v44  ;;  %1309 = vmatprep.mubr.msk.f32.mxu1 %vm392_vm5, %v364_v40 }
  0xec   : > { %1310 = vmatmul.mubr.msk.f32.vlgmr.msra.gmra.mrb[0].mxu1 %vm392_vm5, %v365_v42  ;;  %v367_v48 = vmax.f32 %v301_v43, 0.0 }
  0xed   : > { %v366_v46 = vmax.f32 %v296_v45, 0.0  ;;  %v1279_v47 = vpop.f32.mrb[4].mxu0  ;;  %1426 = vmatpush3.bf16.msk.msra.mxu1 %vm1579_vm6, %v1419_v23 }
  0xee   : > { %v311_v49 = vadd.f32 %v1279_v47, %v1115_v35  ;;  %v305_v50 = vpop.f32.mrb[5].mxu0 }
  0xef   : > { %v306_v51 = vadd.f32 %v1115_v35, %v305_v50  ;;  %1312 = vmatprep.mubr.msk.f32.mxu1 %vm392_vm5, %v366_v46 }
  0xf0   : > { %1313 = vmatmul.mubr.msk.f32.gmra.mrb[2].mxu1 %vm392_vm5, %v367_v48  ;;  %v369_v54 = vmax.f32 %v311_v49, 0.0 }
  0xf1   : > { %v368_v52 = vmax.f32 %v306_v51, 0.0  ;;  %v1282_v53 = vpop.f32.mrb[6].mxu0 }
  0xf2   : > { %v321_v55 = vadd.f32 %v1282_v53, %v1115_v35  ;;  %v315_v56 = vpop.f32.mrb[7].mxu0 }
  0xf3   : > { %v316_v57 = vadd.f32 %v1115_v35, %v315_v56  ;;  %1315 = vmatprep.mubr.msk.f32.mxu1 %vm392_vm5, %v368_v52 }
  0xf4   : > { %1316 = vmatmul.mubr.msk.f32.gmra.mrb[4].mxu1 %vm392_vm5, %v369_v54  ;;  %v371_v60 = vmax.f32 %v321_v55, 0.0 }
  0xf5   : > { %v370_v58 = vmax.f32 %v316_v57, 0.0  ;;  %v1285_v59 = vpop.f32.mrb[8].mxu0 }
  0xf6   : > { %v331_v61 = vadd.f32 %v1285_v59, %v1115_v35  ;;  %v325_v62 = vpop.f32.mrb[9].mxu0 }
  0xf7   : > { %v326_v63 = vadd.f32 %v1115_v35, %v325_v62  ;;  %1318 = vmatprep.mubr.msk.f32.mxu1 %vm392_vm5, %v370_v58 }
  0xf8   : > { %1319 = vmatmul.mubr.msk.f32.gmra.mrb[6].mxu1 %vm392_vm5, %v371_v60  ;;  %v373_v2 = vmax.f32 %v331_v61, 0.0 }
  0xf9   : > { %v372_v0 = vmax.f32 %v326_v63, 0.0  ;;  %v1288_v1 = vpop.f32.mrb[10].mxu0 }
  0xfa   : > { %v341_v3 = vadd.f32 %v1288_v1, %v1115_v35  ;;  %v335_v4 = vpop.f32.mrb[11].mxu0 }
  0xfb   : > { %v336_v5 = vadd.f32 %v1115_v35, %v335_v4  ;;  %1321 = vmatprep.mubr.msk.f32.mxu1 %vm392_vm5, %v372_v0 }
  0xfc   : > { %1322 = vmatmul.mubr.msk.f32.gmra.mrb[8].mxu1 %vm392_vm5, %v373_v2  ;;  %v375_v8 = vmax.f32 %v341_v3, 0.0 }
  0xfd   : > { %v374_v6 = vmax.f32 %v336_v5, 0.0  ;;  %v1291_v7 = vpop.f32.mrb[12].mxu0 }
  0xfe   : > { %v351_v9 = vadd.f32 %v1291_v7, %v1115_v35  ;;  %v345_v10 = vpop.f32.mrb[13].mxu0 }
  0xff   : > { %v346_v11 = vadd.f32 %v1115_v35, %v345_v10  ;;  %1324 = vmatprep.mubr.msk.f32.mxu1 %vm392_vm5, %v374_v6 }
 0x100   : > { %1325 = vmatmul.mubr.msk.f32.gmra.mrb[10].mxu1 %vm392_vm5, %v375_v8  ;;  %v377_v14 = vmax.f32 %v351_v9, 0.0  ;;  %v1150_v9 = vld [vmem:[%s1675_s1 + $0x78] ss:$0 sm:$0xff] }
 0x101   : > { %v376_v12 = vmax.f32 %v346_v11, 0.0  ;;  %v1294_v13 = vpop.f32.mrb[14].mxu0 }
 0x102   : > { %v361_v15 = vadd.f32 %v1294_v13, %v1115_v35  ;;  %v355_v16 = vpop.f32.mrb[15].mxu0 }
 0x103   : > { %v356_v17 = vadd.f32 %v1115_v35, %v355_v16  ;;  %1327 = vmatprep.mubr.msk.f32.mxu1 %vm392_vm5, %v376_v12 }
 0x104   : > { %1328 = vmatmul.mubr.msk.f32.gmra.mrb[12].mxu1 %vm392_vm5, %v377_v14  ;;  %v379_v19 = vmax.f32 %v361_v15, 0.0 }
 0x105   : > { %v378_v18 = vmax.f32 %v356_v17, 0.0 }
 0x107   : > { %1330 = vmatprep.mubr.msk.f32.mxu1 %vm392_vm5, %v378_v18 }
 0x108   : > { %1331 = vmatmul.mubr.msk.f32.gmra.mrb[14].mxu1 %vm392_vm5, %v379_v19 }
 0x1bf   : > { %v1311_v25 = vpop.f32.mrb[0].mxu1 }
 0x1c0   : > { %v517_v26 = vadd.f32 %v1311_v25, %v1132_v24  ;;  %v511_v27 = vpop.f32.mrb[1].mxu1 }
 0x1c1   : > { %v512_v28 = vadd.f32 %v1132_v24, %v511_v27 }
 0x1c2   : > { %v591_v31 = vmax.f32 %v517_v26, 0.0 }
 0x1c3   : > { %v590_v29 = vmax.f32 %v512_v28, 0.0  ;;  %v1314_v30 = vpop.f32.mrb[2].mxu1 }
 0x1c4   : > { %v527_v32 = vadd.f32 %v1314_v30, %v1132_v24  ;;  %v521_v33 = vpop.f32.mrb[3].mxu1 }
 0x1c5   : > { %v522_v34 = vadd.f32 %v1132_v24, %v521_v33  ;;  %1341 = vmatprep.mubr.msk.f32.mxu0 %vm615_vm7, %v590_v29 }
 0x1c6   : > { %1342 = vmatmul.mubr.msk.f32.vlgmr.msra.gmra.mrb[16].mxu0 %vm615_vm7, %v591_v31  ;;  %v593_v37 = vmax.f32 %v527_v32, 0.0 }
 0x1c7   : > { %v592_v35 = vmax.f32 %v522_v34, 0.0  ;;  %v1317_v36 = vpop.f32.mrb[4].mxu1  ;;  %1424 = vmatpush3.bf16.msk.msra.mxu0 %vm1579_vm6, %v1419_v23 }
 0x1c8   : > { %v537_v38 = vadd.f32 %v1317_v36, %v1132_v24  ;;  %v531_v39 = vpop.f32.mrb[5].mxu1 }
 0x1c9   : > { %v532_v40 = vadd.f32 %v1132_v24, %v531_v39  ;;  %1344 = vmatprep.mubr.msk.f32.mxu0 %vm615_vm7, %v592_v35 }
 0x1ca   : > { %1345 = vmatmul.mubr.msk.f32.gmra.mrb[18].mxu0 %vm615_vm7, %v593_v37  ;;  %v595_v43 = vmax.f32 %v537_v38, 0.0 }
 0x1cb   : > { %v594_v41 = vmax.f32 %v532_v40, 0.0  ;;  %v1320_v42 = vpop.f32.mrb[6].mxu1 }
 0x1cc   : > { %v547_v44 = vadd.f32 %v1320_v42, %v1132_v24  ;;  %v541_v45 = vpop.f32.mrb[7].mxu1 }
 0x1cd   : > { %v542_v46 = vadd.f32 %v1132_v24, %v541_v45  ;;  %1347 = vmatprep.mubr.msk.f32.mxu0 %vm615_vm7, %v594_v41 }
 0x1ce   : > { %1348 = vmatmul.mubr.msk.f32.gmra.mrb[20].mxu0 %vm615_vm7, %v595_v43  ;;  %v597_v49 = vmax.f32 %v547_v44, 0.0 }
 0x1cf   : > { %v596_v47 = vmax.f32 %v542_v46, 0.0  ;;  %v1323_v48 = vpop.f32.mrb[8].mxu1 }
 0x1d0   : > { %v557_v50 = vadd.f32 %v1323_v48, %v1132_v24  ;;  %v551_v51 = vpop.f32.mrb[9].mxu1 }
 0x1d1   : > { %v552_v52 = vadd.f32 %v1132_v24, %v551_v51  ;;  %1350 = vmatprep.mubr.msk.f32.mxu0 %vm615_vm7, %v596_v47 }
 0x1d2   : > { %1351 = vmatmul.mubr.msk.f32.gmra.mrb[22].mxu0 %vm615_vm7, %v597_v49  ;;  %v599_v55 = vmax.f32 %v557_v50, 0.0 }
 0x1d3   : > { %v598_v53 = vmax.f32 %v552_v52, 0.0  ;;  %v1326_v54 = vpop.f32.mrb[10].mxu1 }
 0x1d4   : > { %v567_v56 = vadd.f32 %v1326_v54, %v1132_v24  ;;  %v561_v57 = vpop.f32.mrb[11].mxu1 }
 0x1d5   : > { %v562_v58 = vadd.f32 %v1132_v24, %v561_v57  ;;  %1353 = vmatprep.mubr.msk.f32.mxu0 %vm615_vm7, %v598_v53 }
 0x1d6   : > { %1354 = vmatmul.mubr.msk.f32.gmra.mrb[24].mxu0 %vm615_vm7, %v599_v55  ;;  %v601_v61 = vmax.f32 %v567_v56, 0.0 }
 0x1d7   : > { %v600_v59 = vmax.f32 %v562_v58, 0.0  ;;  %v1329_v60 = vpop.f32.mrb[12].mxu1  ;;  %v1168_v58 = vld [vmem:[%s1675_s1 + $0x90] ss:$0 sm:$0xff] }
 0x1d8   : > { %v577_v62 = vadd.f32 %v1329_v60, %v1132_v24  ;;  %v571_v63 = vpop.f32.mrb[13].mxu1 }
 0x1d9   : > { %v572_v0 = vadd.f32 %v1132_v24, %v571_v63  ;;  %1356 = vmatprep.mubr.msk.f32.mxu0 %vm615_vm7, %v600_v59 }
 0x1da   : > { %1357 = vmatmul.mubr.msk.f32.gmra.mrb[26].mxu0 %vm615_vm7, %v601_v61  ;;  %v603_v3 = vmax.f32 %v577_v62, 0.0 }
 0x1db   : > { %v602_v1 = vmax.f32 %v572_v0, 0.0  ;;  %v1332_v2 = vpop.f32.mrb[14].mxu1 }
 0x1dc   : > { %v587_v4 = vadd.f32 %v1332_v2, %v1132_v24  ;;  %v581_v5 = vpop.f32.mrb[15].mxu1 }
 0x1dd   : > { %v582_v6 = vadd.f32 %v1132_v24, %v581_v5  ;;  %1359 = vmatprep.mubr.msk.f32.mxu0 %vm615_vm7, %v602_v1 }
 0x1de   : > { %1360 = vmatmul.mubr.msk.f32.gmra.mrb[28].mxu0 %vm615_vm7, %v603_v3  ;;  %v605_v8 = vmax.f32 %v587_v4, 0.0 }
 0x1df   : > { %v604_v7 = vmax.f32 %v582_v6, 0.0 }
 0x1e1   : > { %1362 = vmatprep.mubr.msk.f32.mxu0 %vm615_vm7, %v604_v7 }
 0x1e2   : > { %1363 = vmatmul.mubr.msk.f32.gmra.mrb[30].mxu0 %vm615_vm7, %v605_v8 }
 0x299   : > { %v1343_v10 = vpop.f32.mrb[16].mxu0 }
 0x29a   : > { %v740_v11 = vadd.f32 %v1343_v10, %v1150_v9  ;;  %v734_v12 = vpop.f32.mrb[17].mxu0 }
 0x29b   : > { %v735_v13 = vadd.f32 %v1150_v9, %v734_v12 }
 0x29c   : > { %v814_v16 = vmax.f32 %v740_v11, 0.0 }
 0x29d   : > { %v813_v14 = vmax.f32 %v735_v13, 0.0  ;;  %v1346_v15 = vpop.f32.mrb[18].mxu0 }
 0x29e   : > { %v750_v17 = vadd.f32 %v1346_v15, %v1150_v9  ;;  %v744_v18 = vpop.f32.mrb[19].mxu0 }
 0x29f   : > { %v745_v19 = vadd.f32 %v1150_v9, %v744_v18  ;;  %1369 = vmatprep.mubr.msk.f32.mxu0 %vm836_vm8, %v813_v14 }
 0x2a0   : > { %1370 = vmatmul.mubr.msk.f32.vlgmr.msra.gmra.mrb[32].mxu0 %vm836_vm8, %v814_v16  ;;  %v816_v22 = vmax.f32 %v750_v17, 0.0 }
 0x2a1   : > { %v815_v20 = vmax.f32 %v745_v19, 0.0  ;;  %v1349_v21 = vpop.f32.mrb[20].mxu0 }
 0x2a2   : > { %v760_v23 = vadd.f32 %v1349_v21, %v1150_v9  ;;  %v754_v24 = vpop.f32.mrb[21].mxu0 }
 0x2a3   : > { %v755_v25 = vadd.f32 %v1150_v9, %v754_v24  ;;  %1372 = vmatprep.mubr.msk.f32.mxu1 %vm836_vm8, %v815_v20 }
 0x2a4   : > { %1373 = vmatmul.mubr.msk.f32.vlgmr.msra.gmra.mrb[16].mxu1 %vm836_vm8, %v816_v22  ;;  %v818_v28 = vmax.f32 %v760_v23, 0.0 }
 0x2a5   : > { %v817_v26 = vmax.f32 %v755_v25, 0.0  ;;  %v1352_v27 = vpop.f32.mrb[22].mxu0 }
 0x2a6   : > { %v770_v29 = vadd.f32 %v1352_v27, %v1150_v9  ;;  %v764_v30 = vpop.f32.mrb[23].mxu0 }
 0x2a7   : > { %v765_v31 = vadd.f32 %v1150_v9, %v764_v30  ;;  %1375 = vmatprep.mubr.msk.f32.mxu1 %vm836_vm8, %v817_v26 }
 0x2a8   : > { %1376 = vmatmul.mubr.msk.f32.gmra.mrb[18].mxu1 %vm836_vm8, %v818_v28  ;;  %v820_v34 = vmax.f32 %v770_v29, 0.0 }
 0x2a9   : > { %v819_v32 = vmax.f32 %v765_v31, 0.0  ;;  %v1355_v33 = vpop.f32.mrb[24].mxu0 }
 0x2aa   : > { %v780_v35 = vadd.f32 %v1355_v33, %v1150_v9  ;;  %v774_v36 = vpop.f32.mrb[25].mxu0 }
 0x2ab   : > { %v775_v37 = vadd.f32 %v1150_v9, %v774_v36  ;;  %1378 = vmatprep.mubr.msk.f32.mxu1 %vm836_vm8, %v819_v32 }
 0x2ac   : > { %1379 = vmatmul.mubr.msk.f32.gmra.mrb[20].mxu1 %vm836_vm8, %v820_v34  ;;  %v822_v40 = vmax.f32 %v780_v35, 0.0 }
 0x2ad   : > { %v821_v38 = vmax.f32 %v775_v37, 0.0  ;;  %v1358_v39 = vpop.f32.mrb[26].mxu0 }
 0x2ae   : > { %v790_v41 = vadd.f32 %v1358_v39, %v1150_v9  ;;  %v784_v42 = vpop.f32.mrb[27].mxu0 }
 0x2af   : > { %v785_v43 = vadd.f32 %v1150_v9, %v784_v42  ;;  %1381 = vmatprep.mubr.msk.f32.mxu1 %vm836_vm8, %v821_v38 }
 0x2b0   : > { %1382 = vmatmul.mubr.msk.f32.gmra.mrb[22].mxu1 %vm836_vm8, %v822_v40  ;;  %v824_v46 = vmax.f32 %v790_v41, 0.0 }
 0x2b1   : > { %v823_v44 = vmax.f32 %v785_v43, 0.0  ;;  %v1361_v45 = vpop.f32.mrb[28].mxu0 }
 0x2b2   : > { %v800_v47 = vadd.f32 %v1361_v45, %v1150_v9  ;;  %v794_v48 = vpop.f32.mrb[29].mxu0 }
 0x2b3   : > { %v795_v49 = vadd.f32 %v1150_v9, %v794_v48  ;;  %1384 = vmatprep.mubr.msk.f32.mxu1 %vm836_vm8, %v823_v44 }
 0x2b4   : > { %1385 = vmatmul.mubr.msk.f32.gmra.mrb[24].mxu1 %vm836_vm8, %v824_v46  ;;  %v826_v52 = vmax.f32 %v800_v47, 0.0 }
 0x2b5   : > { %v825_v50 = vmax.f32 %v795_v49, 0.0  ;;  %v1364_v51 = vpop.f32.mrb[30].mxu0 }
 0x2b6   : > { %v810_v53 = vadd.f32 %v1364_v51, %v1150_v9  ;;  %v804_v54 = vpop.f32.mrb[31].mxu0 }
 0x2b7   : > { %v805_v55 = vadd.f32 %v1150_v9, %v804_v54  ;;  %1387 = vmatprep.mubr.msk.f32.mxu1 %vm836_vm8, %v825_v50 }
 0x2b8   : > { %1388 = vmatmul.mubr.msk.f32.gmra.mrb[26].mxu1 %vm836_vm8, %v826_v52  ;;  %v828_v57 = vmax.f32 %v810_v53, 0.0 }
 0x2b9   : > { %v827_v56 = vmax.f32 %v805_v55, 0.0 }
 0x2bb   : > { %1390 = vmatprep.mubr.msk.f32.mxu1 %vm836_vm8, %v827_v56 }
 0x2bc   : > { %1391 = vmatmul.mubr.msk.f32.gmra.mrb[28].mxu1 %vm836_vm8, %v828_v57 }
 0x373   : > { %v1371_v59 = vpop.f32.mrb[32].mxu0 }
 0x374   : > { %v960_v60 = vadd.f32 %v1371_v59, %v1168_v58  ;;  %v954_v61 = vpop.f32.mrb[33].mxu0 }
 0x375   : > { %v955_v62 = vadd.f32 %v1168_v58, %v954_v61 }
 0x376   : > { %1035 = vst.msk [vmem:[%s1637_s3 + $0x8] sm:$0xff] %vm1033_vm9, %v960_v60 }
 0x377   : > { %1034 = vst.msk [vmem:[%s1637_s3] sm:$0xff] %vm1033_vm9, %v955_v62  ;;  %v1374_v63 = vpop.f32.mrb[16].mxu1 }
 0x378   : > { %v970_v0 = vadd.f32 %v1374_v63, %v1168_v58  ;;  %v964_v1 = vpop.f32.mrb[17].mxu1 }
 0x379   : > { %v965_v2 = vadd.f32 %v1168_v58, %v964_v1 }
 0x37a   : > { %1037 = vst.msk [vmem:[%s1637_s3 + $0x18] sm:$0xff] %vm1033_vm9, %v970_v0 }
 0x37b   : > { %1036 = vst.msk [vmem:[%s1637_s3 + $0x10] sm:$0xff] %vm1033_vm9, %v965_v2  ;;  %v1377_v3 = vpop.f32.mrb[18].mxu1 }
 0x37c   : > { %v980_v4 = vadd.f32 %v1377_v3, %v1168_v58  ;;  %v974_v5 = vpop.f32.mrb[19].mxu1 }
 0x37d   : > { %v975_v6 = vadd.f32 %v1168_v58, %v974_v5 }
 0x37e   : > { %1039 = vst.msk [vmem:[%s1637_s3 + $0x28] sm:$0xff] %vm1033_vm9, %v980_v4 }
 0x37f   : > { %1038 = vst.msk [vmem:[%s1637_s3 + $0x20] sm:$0xff] %vm1033_vm9, %v975_v6  ;;  %v1380_v7 = vpop.f32.mrb[20].mxu1 }
 0x380   : > { %v990_v8 = vadd.f32 %v1380_v7, %v1168_v58  ;;  %v984_v9 = vpop.f32.mrb[21].mxu1 }
 0x381   : > { %v985_v10 = vadd.f32 %v1168_v58, %v984_v9 }
 0x382   : > { %1041 = vst.msk [vmem:[%s1637_s3 + $0x38] sm:$0xff] %vm1033_vm9, %v990_v8 }
 0x383   : > { %1040 = vst.msk [vmem:[%s1637_s3 + $0x30] sm:$0xff] %vm1033_vm9, %v985_v10  ;;  %v1383_v11 = vpop.f32.mrb[22].mxu1 }
 0x384   : > { %v1000_v12 = vadd.f32 %v1383_v11, %v1168_v58  ;;  %v994_v13 = vpop.f32.mrb[23].mxu1 }
 0x385   : > { %v995_v14 = vadd.f32 %v1168_v58, %v994_v13 }
 0x386   : > { %1043 = vst.msk [vmem:[%s1637_s3 + $0x48] sm:$0xff] %vm1033_vm9, %v1000_v12 }
 0x387   : > { %1042 = vst.msk [vmem:[%s1637_s3 + $0x40] sm:$0xff] %vm1033_vm9, %v995_v14  ;;  %v1386_v15 = vpop.f32.mrb[24].mxu1 }
 0x388   : > { %v1010_v16 = vadd.f32 %v1386_v15, %v1168_v58  ;;  %v1004_v17 = vpop.f32.mrb[25].mxu1 }
 0x389   : > { %v1005_v18 = vadd.f32 %v1168_v58, %v1004_v17 }
 0x38a   : > { %1045 = vst.msk [vmem:[%s1637_s3 + $0x58] sm:$0xff] %vm1033_vm9, %v1010_v16 }
 0x38b   : > { %1044 = vst.msk [vmem:[%s1637_s3 + $0x50] sm:$0xff] %vm1033_vm9, %v1005_v18  ;;  %v1389_v19 = vpop.f32.mrb[26].mxu1 }
 0x38c   : > { %v1020_v20 = vadd.f32 %v1389_v19, %v1168_v58  ;;  %v1014_v21 = vpop.f32.mrb[27].mxu1 }
 0x38d   : > { %v1015_v22 = vadd.f32 %v1168_v58, %v1014_v21 }
 0x38e   : > { %1047 = vst.msk [vmem:[%s1637_s3 + $0x68] sm:$0xff] %vm1033_vm9, %v1020_v20 }
 0x38f   : > { %1046 = vst.msk [vmem:[%s1637_s3 + $0x60] sm:$0xff] %vm1033_vm9, %v1015_v22  ;;  %v1392_v23 = vpop.f32.mrb[28].mxu1 }
 0x390   : > { %v1030_v24 = vadd.f32 %v1392_v23, %v1168_v58  ;;  %v1024_v25 = vpop.f32.mrb[29].mxu1 }
 0x391   : > { %v1025_v26 = vadd.f32 %v1168_v58, %v1024_v25 }
 0x392   : > { %1049 = vst.msk [vmem:[%s1637_s3 + $0x78] sm:$0xff] %vm1033_vm9, %v1030_v24 }
 0x393   : > { %1048 = vst.msk [vmem:[%s1637_s3 + $0x70] sm:$0xff] %vm1033_vm9, %v1025_v26 }
 0x394 PF: > { %s12_s9 = sadd.s32 1, %s1442_s9  }
 0x395   : > { %p9_p4 = scmp.ge.s32.totalorder %s12_s9, 4  }
 0x397   :  { %11 = sbr.rel (!%p9_p4) target bundleno = 1 (0x1), region = 58 }

</bundles_post_ra>
